<compile_context>
chip_gen: v7x
topology: tpu7x:2x2x1
jax: 0.10.0
libtpu: 0.0.40
codegen_flags: <defaults>
</compile_context>

<pallas_src>
import math

import jax
import jax.numpy as jnp
from jax.experimental import pallas as pl
from jax.experimental.pallas import tpu as pltpu


def _layernorm_kernel(x_ref, w_ref, b_ref, o_ref):
    # x_ref: (row_tile, C) tile; w_ref/b_ref: (1, C) pre-cast to f32.
    x = x_ref[...].astype(jnp.float32)
    mu = jnp.mean(x, axis=-1, keepdims=True)
    xc = x - mu
    var = jnp.mean(xc * xc, axis=-1, keepdims=True)   # biased var (unbiased=False)
    inv = jax.lax.rsqrt(var + 1e-05)
    y = xc * inv * w_ref[...] + b_ref[...]
    o_ref[...] = y.astype(o_ref.dtype)


def _round_up(n, m):
    return ((n + m - 1) // m) * m


def _choose_row_tile(R, C, itemsize, target_block_bytes=2 << 20):
    """Row tile giving a ~2 MiB block: power-of-two in [256, 4096], aligned to
    sublane packing (8 rows for f32, 16 for bf16), never taller than the
    sublane-padded row count."""
    packing = max(1, 4 // max(1, itemsize))     # rows per 32-bit sublane group
    row_align = 8 * packing
    raw = max(1, target_block_bytes // max(1, C * itemsize))
    rt = 1 << int(math.floor(math.log2(raw)))
    rt = max(256, min(rt, 4096))
    rt = max(row_align, (rt // row_align) * row_align)
    rt = min(rt, _round_up(R, row_align))
    return rt


def with_bias_layernorm(x, weight, bias, *, row_tile=None):
    """x: (..., C); weight, bias: (C,).  Normalizes over the last axis."""
    # TODO(synk): for production C < 128 a lane-dense repack (pack 128//C rows
    # per lane group) would avoid masked vst / idle lanes; skipped here.
    orig_shape = x.shape
    C = orig_shape[-1]
    R = 1
    for d in orig_shape[:-1]:
        R *= d
    x2 = x.reshape(R, C)
    # Pre-cast params to f32 once so the kernel does not re-cast every tile.
    w2 = weight.astype(jnp.float32).reshape(1, C)
    b2 = bias.astype(jnp.float32).reshape(1, C)

    itemsize = jnp.dtype(x.dtype).itemsize
    if row_tile is None:
        row_tile = _choose_row_tile(R, C, itemsize)

    grid = (pl.cdiv(R, row_tile),)   # boundary block is masked on writeback

    # VMEM budget: 2x double-buffered (input + output) blocks + params, with
    # headroom.  >= 32 MiB (beats v5e's 16 MiB scoped default), <= 48 MiB
    # (stays under v7x's 64 MiB physical VMEM).
    block_bytes = row_tile * C * itemsize
    needed = 4 * block_bytes + 2 * C * 4
    vmem_limit = int(min(48 << 20, max(32 << 20, 2 * needed)))

    out = pl.pallas_call(
        _layernorm_kernel,
        out_shape=jax.ShapeDtypeStruct((R, C), x.dtype),
        grid_spec=pltpu.PrefetchScalarGridSpec(
            num_scalar_prefetch=0,
            grid=grid,
            in_specs=[
                pl.BlockSpec((row_tile, C), lambda i: (i, 0)),
                pl.BlockSpec((1, C), lambda i: (0, 0)),
                pl.BlockSpec((1, C), lambda i: (0, 0)),
            ],
            out_specs=pl.BlockSpec((row_tile, C), lambda i: (i, 0)),
        ),
        compiler_params=pltpu.CompilerParams(
            dimension_semantics=("parallel",),   # shards across both TCs on v7x
            vmem_limit_bytes=vmem_limit,
        ),
    )(x2, w2, b2)

    return out.reshape(orig_shape)


def _ref_layernorm(x, weight, bias):
    xf = x.astype(jnp.float32)
    mu = jnp.mean(xf, axis=-1, keepdims=True)
    var = jnp.mean((xf - mu) ** 2, axis=-1, keepdims=True)
    y = (xf - mu) / jnp.sqrt(var + 1e-05) * weight.astype(jnp.float32) \
        + bias.astype(jnp.float32)
    return y.astype(x.dtype)


def _to_3d(x_nchw):
    B, C, H, W = x_nchw.shape
    return jnp.transpose(x_nchw, (0, 2, 3, 1)).reshape(B, H * W, C)


if __name__ == "__main__":
    key = jax.random.PRNGKey(0)
    k1, k2, k3, k4 = jax.random.split(key, 4)

    # Case 1: wpn.py-style usage: NCHW -> to_3d -> (B, H*W, C), normalized over C.
    B, Cc, H, W = 2, 32, 8, 8
    x_nchw = jax.random.normal(k1, (B, Cc, H, W), dtype=jnp.float32)
    x3d = _to_3d(x_nchw)
    w = jnp.ones((Cc,), dtype=jnp.float32)    # nn.Parameter(torch.ones)
    b = jnp.zeros((Cc,), dtype=jnp.float32)   # nn.Parameter(torch.zeros)
    y = jax.block_until_ready(with_bias_layernorm(x3d, w, b))
    y_ref = _ref_layernorm(x3d, w, b)
    assert jnp.allclose(y, y_ref, atol=1e-5, rtol=1e-5), "case 1 mismatch vs reference"

    # Case 2: lane-dense C=128, row count NOT divisible by the tile
    # (exercises the cdiv grid + masked boundary block) and nontrivial affine.
    B2, S2, C2 = 3, 100, 128
    x2 = jax.random.normal(k2, (B2, S2, C2), dtype=jnp.float32)
    w2 = 1.0 + 0.1 * jax.random.normal(k3, (C2,), dtype=jnp.float32)
    b2 = 0.1 * jax.random.normal(k4, (C2,), dtype=jnp.float32)
    y2 = jax.block_until_ready(with_bias_layernorm(x2, w2, b2, row_tile=64))
    y2_ref = _ref_layernorm(x2, w2, b2)
    assert jnp.allclose(y2, y2_ref, atol=1e-5, rtol=1e-5), "case 2 mismatch vs reference"

    print("KERNEL_OK")
</pallas_src>

<mosaic_0001>
module attributes {stable_mosaic.version = 11 : i64} {
  func.func @_layernorm_kernel(%arg0: i32, %arg1: memref<128x32xf32, #tpu.memory_space<vmem>>, %arg2: memref<1x32xf32, #tpu.memory_space<vmem>>, %arg3: memref<1x32xf32, #tpu.memory_space<vmem>>, %arg4: memref<128x32xf32, #tpu.memory_space<vmem>>) attributes {dimension_semantics = [#tpu.dimension_semantics<parallel>], iteration_bounds = array<i64: 1>, scalar_prefetch = 0 : i64, scratch_operands = 0 : i64, tpu.core_type = #tpu.core_type<tc>, window_params = [{transform_indices = @transform_0, window_bounds = array<i64: 128, 32>}, {pipeline_mode = #tpu.pipeline_mode<synchronous>, transform_indices = @transform_1, window_bounds = array<i64: 1, 32>}, {pipeline_mode = #tpu.pipeline_mode<synchronous>, transform_indices = @transform_2, window_bounds = array<i64: 1, 32>}, {transform_indices = @transform_3, window_bounds = array<i64: 128, 32>}]} {
    %c0 = arith.constant 0 : index
    %c0_0 = arith.constant 0 : index
    %0 = vector.load %arg1[%c0, %c0_0] : memref<128x32xf32, #tpu.memory_space<vmem>>, vector<128x32xf32>
    %cst = arith.constant dense<0.000000e+00> : vector<128xf32>
    %1 = vector.multi_reduction <add>, %0, %cst [1] : vector<128x32xf32> to vector<128xf32>
    %2 = vector.shape_cast %1 : vector<128xf32> to vector<128x1xf32>
    %cst_1 = arith.constant 3.200000e+01 : f32
    %3 = vector.broadcast %cst_1 : f32 to vector<128x1xf32>
    %4 = arith.divf %2, %3 : vector<128x1xf32>
    %5 = vector.broadcast %4 : vector<128x1xf32> to vector<128x32xf32>
    %6 = arith.subf %0, %5 : vector<128x32xf32>
    %7 = arith.mulf %6, %6 : vector<128x32xf32>
    %cst_2 = arith.constant dense<0.000000e+00> : vector<128xf32>
    %8 = vector.multi_reduction <add>, %7, %cst_2 [1] : vector<128x32xf32> to vector<128xf32>
    %9 = vector.shape_cast %8 : vector<128xf32> to vector<128x1xf32>
    %cst_3 = arith.constant 3.200000e+01 : f32
    %10 = vector.broadcast %cst_3 : f32 to vector<128x1xf32>
    %11 = arith.divf %9, %10 : vector<128x1xf32>
    %cst_4 = arith.constant 9.99999974E-6 : f32
    %12 = vector.broadcast %cst_4 : f32 to vector<128x1xf32>
    %13 = arith.addf %11, %12 : vector<128x1xf32>
    %14 = math.rsqrt %13 : vector<128x1xf32>
    %15 = vector.broadcast %14 : vector<128x1xf32> to vector<128x32xf32>
    %16 = arith.mulf %6, %15 : vector<128x32xf32>
    %c0_5 = arith.constant 0 : index
    %c0_6 = arith.constant 0 : index
    %17 = vector.load %arg2[%c0_5, %c0_6] : memref<1x32xf32, #tpu.memory_space<vmem>>, vector<1x32xf32>
    %18 = vector.broadcast %17 : vector<1x32xf32> to vector<128x32xf32>
    %19 = arith.mulf %16, %18 : vector<128x32xf32>
    %c0_7 = arith.constant 0 : index
    %c0_8 = arith.constant 0 : index
    %20 = vector.load %arg3[%c0_7, %c0_8] : memref<1x32xf32, #tpu.memory_space<vmem>>, vector<1x32xf32>
    %21 = vector.broadcast %20 : vector<1x32xf32> to vector<128x32xf32>
    %22 = arith.addf %19, %21 : vector<128x32xf32>
    %c0_9 = arith.constant 0 : index
    %c0_10 = arith.constant 0 : index
    %23 = vector.load %arg4[%c0_9, %c0_10] : memref<128x32xf32, #tpu.memory_space<vmem>>, vector<128x32xf32>
    tpu.vector_store %arg4[%c0_9, %c0_10], %22 {strides = array<i32>} : memref<128x32xf32, #tpu.memory_space<vmem>>, vector<128x32xf32>,
    return
  }
  func.func @transform_0(%arg0: i32) -> (i32, i32) {
    %c0_i32 = arith.constant 0 : i32
    %c0_i32_0 = arith.constant 0 : i32
    return %arg0, %c0_i32 : i32, i32
  }
  func.func @transform_1(%arg0: i32) -> (i32, i32) {
    %c0_i32 = arith.constant 0 : i32
    %c0_i32_0 = arith.constant 0 : i32
    %c0_i32_1 = arith.constant 0 : i32
    return %c0_i32, %c0_i32_0 : i32, i32
  }
  func.func @transform_2(%arg0: i32) -> (i32, i32) {
    %c0_i32 = arith.constant 0 : i32
    %c0_i32_0 = arith.constant 0 : i32
    %c0_i32_1 = arith.constant 0 : i32
    return %c0_i32, %c0_i32_0 : i32, i32
  }
  func.func @transform_3(%arg0: i32) -> (i32, i32) {
    %c0_i32 = arith.constant 0 : i32
    %c0_i32_0 = arith.constant 0 : i32
    return %arg0, %c0_i32 : i32, i32
  }
}

</mosaic_0001>

<bundles_post_ra>
// kernel: tpu_custom_call.1
= control target key start
LH: loop header
LB: loop body
LE: loop exit
PB: predicated region body
PF: predicated region fallthrough
CT: control target
= control target key end

     0   :  { %vm30_vm0 = vcmask 261120   ;;  %s666_s0 = inlined_call_operand.vmem [shape: f32[128,32], index: 0, kind: input, shape index: {}]   ;;  %s667_s1 = inlined_call_operand.vmem [shape: f32[1,32], index: 1, kind: input, shape index: {}]   ;;  %s668_s2 = inlined_call_operand.vmem [shape: f32[1,32], index: 2, kind: input, shape index: {}]   ;;  %s669_s3 = inlined_call_operand.vmem [shape: f32[128,32], index: 3, kind: output, shape index: {}]  }
   0x1   :  { %v14_v0 = vld [vmem:[%s666_s0] sm:$0xff]  ;;  %v16_v1 = vld [vmem:[%s666_s0 + $0x10] sm:$0xff]  ;;  %v15_v2 = vld [vmem:[%s666_s0 + $0x8] sm:$0xff] }
   0x2   :  { %v31_v3 = vsel %vm30_vm0, %v14_v0, 0.0  ;;  %v37_v4 = vsel %vm30_vm0, %v16_v1, 0.0  ;;  %v17_v5 = vld [vmem:[%s666_s0 + $0x18] sm:$0xff]  ;;  %v34_v6 = vsel %vm30_vm0, %v15_v2, 0.0  ;;  %v18_v8 = vld [vmem:[%s666_s0 + $0x20] sm:$0xff]  ;;  %v19_v9 = vld [vmem:[%s666_s0 + $0x28] sm:$0xff] }
   0x3   :  { %32 = vadd.xlane.f32.xlu0 %v31_v3  ;;  %38 = vadd.xlane.f32.xlu1 %v37_v4  ;;  %v40_v7 = vsel %vm30_vm0, %v17_v5, 0.0  ;;  %v43_v10 = vsel %vm30_vm0, %v18_v8, 0.0  ;;  %v46_v11 = vsel %vm30_vm0, %v19_v9, 0.0  ;;  %v387_v12 = vld [vmem:[%s666_s0 + $0x30] sm:$0xff]  ;;  %v392_v13 = vld [vmem:[%s666_s0 + $0x38] sm:$0xff]  ;;  %v401_v16 = vld [vmem:[%s666_s0 + $0x40] sm:$0xff] }
   0x4   :  { %v49_v14 = vsel %vm30_vm0, %v387_v12, 0.0  ;;  %v52_v15 = vsel %vm30_vm0, %v392_v13, 0.0  ;;  %v406_v17 = vld [vmem:[%s666_s0 + $0x48] sm:$0xff]  ;;  %v55_v18 = vsel %vm30_vm0, %v401_v16, 0.0  ;;  %v415_v20 = vld [vmem:[%s666_s0 + $0x50] sm:$0xff]  ;;  %v420_v21 = vld [vmem:[%s666_s0 + $0x58] sm:$0xff] }
   0x5   :  { %v58_v19 = vsel %vm30_vm0, %v406_v17, 0.0  ;;  %v61_v22 = vsel %vm30_vm0, %v415_v20, 0.0  ;;  %v64_v23 = vsel %vm30_vm0, %v420_v21, 0.0  ;;  %v429_v24 = vld [vmem:[%s666_s0 + $0x60] sm:$0xff]  ;;  %v434_v25 = vld [vmem:[%s666_s0 + $0x68] sm:$0xff]  ;;  %v443_v28 = vld [vmem:[%s666_s0 + $0x70] sm:$0xff] }
   0x6   :  { %v67_v26 = vsel %vm30_vm0, %v429_v24, 0.0  ;;  %v70_v27 = vsel %vm30_vm0, %v434_v25, 0.0  ;;  %v448_v29 = vld [vmem:[%s666_s0 + $0x78] sm:$0xff]  ;;  %v73_v30 = vsel %vm30_vm0, %v443_v28, 0.0 }
   0x7   :  { %35 = vadd.xlane.f32.xlu0 %v34_v6  ;;  %41 = vadd.xlane.f32.xlu1 %v40_v7  ;;  %v76_v31 = vsel %vm30_vm0, %v448_v29, 0.0 }
   0xb   :  { %44 = vadd.xlane.f32.xlu0 %v43_v10  ;;  %47 = vadd.xlane.f32.xlu1 %v46_v11 }
   0xf   :  { %50 = vadd.xlane.f32.xlu0 %v49_v14  ;;  %53 = vadd.xlane.f32.xlu1 %v52_v15 }
  0x13   :  { %56 = vadd.xlane.f32.xlu0 %v55_v18  ;;  %59 = vadd.xlane.f32.xlu1 %v58_v19 }
  0x17   :  { %62 = vadd.xlane.f32.xlu0 %v61_v22  ;;  %65 = vadd.xlane.f32.xlu1 %v64_v23 }
  0x1b   :  { %68 = vadd.xlane.f32.xlu0 %v67_v26  ;;  %71 = vadd.xlane.f32.xlu1 %v70_v27 }
  0x1f   :  { %74 = vadd.xlane.f32.xlu0 %v73_v30  ;;  %77 = vadd.xlane.f32.xlu1 %v76_v31 }
  0x90   :  { %v33_v32 = vpop.xlane.xlu0 %32  ;;  %v39_v33 = vpop.xlane.xlu1 %38 }
  0x91   :  { %v80_v34 = vmul.f32 0.03125, %v33_v32  ;;  %v82_v35 = vmul.f32 0.03125, %v39_v33 }
  0x93   :  { %v454_v36 = vsub.f32 %v14_v0, %v80_v34  ;;  %v456_v37 = vsub.f32 %v16_v1, %v82_v35 }
  0x94   :  { %v36_v38 = vpop.xlane.xlu0 %35  ;;  %v42_v39 = vpop.xlane.xlu1 %41 }
  0x95   :  { %v81_v40 = vmul.f32 0.03125, %v36_v38  ;;  %v83_v41 = vmul.f32 0.03125, %v42_v39  ;;  %v112_v42 = vmul.f32 %v454_v36, %v454_v36  ;;  %v114_v43 = vmul.f32 %v456_v37, %v456_v37 }
  0x97   :  { %v462_v44 = vsub.f32 %v15_v2, %v81_v40  ;;  %v464_v45 = vsub.f32 %v17_v5, %v83_v41  ;;  %v128_v46 = vsel %vm30_vm0, %v112_v42, 0.0  ;;  %v134_v49 = vsel %vm30_vm0, %v114_v43, 0.0 }
  0x98   :  { %129 = vadd.xlane.f32.xlu0 %v128_v46  ;;  %v45_v47 = vpop.xlane.xlu0 %44  ;;  %v48_v48 = vpop.xlane.xlu1 %47 }
  0x99   :  { %v84_v50 = vmul.f32 0.03125, %v45_v47  ;;  %v85_v51 = vmul.f32 0.03125, %v48_v48  ;;  %v113_v52 = vmul.f32 %v462_v44, %v462_v44  ;;  %v115_v53 = vmul.f32 %v464_v45, %v464_v45 }
  0x9b   :  { %v472_v54 = vsub.f32 %v18_v8, %v84_v50  ;;  %v474_v55 = vsub.f32 %v19_v9, %v85_v51  ;;  %v131_v56 = vsel %vm30_vm0, %v113_v52, 0.0  ;;  %v137_v59 = vsel %vm30_vm0, %v115_v53, 0.0 }
  0x9c   :  { %135 = vadd.xlane.f32.xlu0 %v134_v49  ;;  %132 = vadd.xlane.f32.xlu1 %v131_v56  ;;  %v51_v57 = vpop.xlane.xlu0 %50  ;;  %v54_v58 = vpop.xlane.xlu1 %53 }
  0x9d   :  { %v86_v60 = vmul.f32 0.03125, %v51_v57  ;;  %v87_v61 = vmul.f32 0.03125, %v54_v58  ;;  %v116_v62 = vmul.f32 %v472_v54, %v472_v54  ;;  %v117_v63 = vmul.f32 %v474_v55, %v474_v55 }
  0x9f   :  { %v483_v0 = vsub.f32 %v387_v12, %v86_v60  ;;  %v486_v1 = vsub.f32 %v392_v13, %v87_v61  ;;  %v140_v2 = vsel %vm30_vm0, %v116_v62, 0.0  ;;  %v143_v5 = vsel %vm30_vm0, %v117_v63, 0.0 }
  0xa0   :  { %138 = vadd.xlane.f32.xlu1 %v137_v59  ;;  %141 = vadd.xlane.f32.xlu0 %v140_v2  ;;  %v57_v3 = vpop.xlane.xlu0 %56  ;;  %v60_v4 = vpop.xlane.xlu1 %59 }
  0xa1   :  { %v88_v6 = vmul.f32 0.03125, %v57_v3  ;;  %v89_v7 = vmul.f32 0.03125, %v60_v4  ;;  %v118_v8 = vmul.f32 %v483_v0, %v483_v0  ;;  %v119_v9 = vmul.f32 %v486_v1, %v486_v1 }
  0xa3   :  { %v495_v10 = vsub.f32 %v401_v16, %v88_v6  ;;  %v498_v11 = vsub.f32 %v406_v17, %v89_v7  ;;  %v146_v12 = vsel %vm30_vm0, %v118_v8, 0.0  ;;  %v149_v15 = vsel %vm30_vm0, %v119_v9, 0.0 }
  0xa4   :  { %144 = vadd.xlane.f32.xlu1 %v143_v5  ;;  %147 = vadd.xlane.f32.xlu0 %v146_v12  ;;  %v63_v13 = vpop.xlane.xlu0 %62  ;;  %v66_v14 = vpop.xlane.xlu1 %65 }
  0xa5   :  { %v90_v18 = vmul.f32 0.03125, %v63_v13  ;;  %v91_v19 = vmul.f32 0.03125, %v66_v14  ;;  %v120_v22 = vmul.f32 %v495_v10, %v495_v10  ;;  %v121_v16 = vmul.f32 %v498_v11, %v498_v11  ;;  %v547_v14 = vld [vmem:[%s667_s1] ss:$0 sm:$0xff] }
  0xa7   :  { %v507_v23 = vsub.f32 %v415_v20, %v90_v18  ;;  %v510_v17 = vsub.f32 %v420_v21, %v91_v19  ;;  %v152_v26 = vsel %vm30_vm0, %v120_v22, 0.0  ;;  %v155_v31 = vsel %vm30_vm0, %v121_v16, 0.0 }
  0xa8   :  { %150 = vadd.xlane.f32.xlu1 %v149_v15  ;;  %153 = vadd.xlane.f32.xlu0 %v152_v26  ;;  %v69_v27 = vpop.xlane.xlu0 %68  ;;  %v72_v30 = vpop.xlane.xlu1 %71  ;;  %v553_v26 = vld [vmem:[%s668_s2] ss:$0 sm:$0xff] }
  0xa9   :  { %v92_v32 = vmul.f32 0.03125, %v69_v27  ;;  %v93_v33 = vmul.f32 0.03125, %v72_v30  ;;  %v122_v34 = vmul.f32 %v507_v23, %v507_v23  ;;  %v123_v20 = vmul.f32 %v510_v17, %v510_v17 }
  0xab   :  { %v519_v35 = vsub.f32 %v429_v24, %v92_v32  ;;  %v522_v21 = vsub.f32 %v434_v25, %v93_v33  ;;  %v158_v38 = vsel %vm30_vm0, %v122_v34, 0.0  ;;  %v161_v41 = vsel %vm30_vm0, %v123_v20, 0.0 }
  0xac   :  { %156 = vadd.xlane.f32.xlu1 %v155_v31  ;;  %159 = vadd.xlane.f32.xlu0 %v158_v38  ;;  %v75_v39 = vpop.xlane.xlu0 %74  ;;  %v78_v40 = vpop.xlane.xlu1 %77 }
  0xad   :  { %v94_v42 = vmul.f32 0.03125, %v75_v39  ;;  %v95_v43 = vmul.f32 0.03125, %v78_v40  ;;  %v124_v46 = vmul.f32 %v519_v35, %v519_v35  ;;  %v125_v24 = vmul.f32 %v522_v21, %v522_v21 }
  0xaf   :  { %v531_v47 = vsub.f32 %v443_v28, %v94_v42  ;;  %v534_v25 = vsub.f32 %v448_v29, %v95_v43  ;;  %v164_v48 = vsel %vm30_vm0, %v124_v46, 0.0  ;;  %v167_v49 = vsel %vm30_vm0, %v125_v24, 0.0 }
  0xb0   :  { %162 = vadd.xlane.f32.xlu1 %v161_v41  ;;  %165 = vadd.xlane.f32.xlu0 %v164_v48 }
  0xb1   :  { %v126_v50 = vmul.f32 %v531_v47, %v531_v47  ;;  %v127_v51 = vmul.f32 %v534_v25, %v534_v25 }
  0xb3   :  { %v170_v52 = vsel %vm30_vm0, %v126_v50, 0.0  ;;  %v173_v28 = vsel %vm30_vm0, %v127_v51, 0.0 }
  0xb4   :  { %168 = vadd.xlane.f32.xlu1 %v167_v49  ;;  %171 = vadd.xlane.f32.xlu0 %v170_v52 }
  0xb8   :  { %174 = vadd.xlane.f32.xlu1 %v173_v28 }
 0x125   :  { %v130_v29 = vpop.xlane.xlu0 %129 }
 0x126   :  { %v176_v53 = vmul.f32 0.03125, %v130_v29 }
 0x128   :  { %v192_v56 = vadd.f32 1e-05, %v176_v53 }
 0x129   :  { %v133_v57 = vpop.xlane.xlu1 %132  ;;  %v136_v58 = vpop.xlane.xlu0 %135 }
 0x12a   :  { %308 = vrsqrt.f32 %v192_v56  ;;  %v177_v59 = vmul.f32 0.03125, %v133_v57  ;;  %v178_v60 = vmul.f32 0.03125, %v136_v58 }
 0x12c   :  { %v193_v61 = vadd.f32 1e-05, %v177_v59  ;;  %v194_v62 = vadd.f32 1e-05, %v178_v60 }
 0x12d   :  { %v139_v63 = vpop.xlane.xlu1 %138  ;;  %v142_v2 = vpop.xlane.xlu0 %141 }
 0x12e   :  { %310 = vrsqrt.f32 %v193_v61  ;;  %v179_v3 = vmul.f32 0.03125, %v139_v63  ;;  %v180_v4 = vmul.f32 0.03125, %v142_v2 }
 0x12f   :  { %312 = vrsqrt.f32 %v194_v62 }
 0x130   :  { %v195_v5 = vadd.f32 1e-05, %v179_v3  ;;  %v196_v6 = vadd.f32 1e-05, %v180_v4 }
 0x131   :  { %v145_v7 = vpop.xlane.xlu1 %144  ;;  %v148_v8 = vpop.xlane.xlu0 %147 }
 0x132   :  { %314 = vrsqrt.f32 %v195_v5  ;;  %v181_v9 = vmul.f32 0.03125, %v145_v7  ;;  %v182_v12 = vmul.f32 0.03125, %v148_v8 }
 0x133   :  { %316 = vrsqrt.f32 %v196_v6 }
 0x134   :  { %v309_v13 = vpop.eup %308  ;;  %v197_v15 = vadd.f32 1e-05, %v181_v9  ;;  %v198_v18 = vadd.f32 1e-05, %v182_v12 }
 0x135   :  { %v224_v19 = vmul.f32 %v309_v13, %v454_v36  ;;  %v151_v22 = vpop.xlane.xlu1 %150  ;;  %v154_v16 = vpop.xlane.xlu0 %153 }
 0x136   :  { %318 = vrsqrt.f32 %v197_v15  ;;  %v183_v27 = vmul.f32 0.03125, %v151_v22  ;;  %v184_v30 = vmul.f32 0.03125, %v154_v16 }
 0x137   :  { %v247_v31 = vmul.f32 %v547_v14, %v224_v19  ;;  %320 = vrsqrt.f32 %v198_v18 }
 0x138   :  { %v311_v32 = vpop.eup %310  ;;  %v199_v33 = vadd.f32 1e-05, %v183_v27  ;;  %v200_v34 = vadd.f32 1e-05, %v184_v30 }
 0x139   :  { %v313_v20 = vpop.eup %312  ;;  %v270_v38 = vadd.f32 %v553_v26, %v247_v31  ;;  %v225_v36 = vmul.f32 %v311_v32, %v462_v44  ;;  %v157_v39 = vpop.xlane.xlu1 %156 }
 0x13a   :  { %v160_v40 = vpop.xlane.xlu0 %159  ;;  %v226_v41 = vmul.f32 %v313_v20, %v456_v37  ;;  %322 = vrsqrt.f32 %v199_v33  ;;  %v185_v42 = vmul.f32 0.03125, %v157_v39 }
 0x13b   :  { %v186_v43 = vmul.f32 0.03125, %v160_v40  ;;  %286 = vst.msk [vmem:[%s669_s3] sm:$0xff] %vm30_vm0, %v270_v38  ;;  %v248_v46 = vmul.f32 %v547_v14, %v225_v36  ;;  %324 = vrsqrt.f32 %v200_v34 }
 0x13c   :  { %v315_v24 = vpop.eup %314  ;;  %v249_v48 = vmul.f32 %v547_v14, %v226_v41  ;;  %v201_v49 = vadd.f32 1e-05, %v185_v42 }
 0x13d   :  { %v202_v44 = vadd.f32 1e-05, %v186_v43  ;;  %v317_v50 = vpop.eup %316  ;;  %v271_v51 = vadd.f32 %v553_v26, %v248_v46  ;;  %v227_v37 = vmul.f32 %v315_v24, %v464_v45  ;;  %v163_v52 = vpop.xlane.xlu1 %162 }
 0x13e   :  { %v166_v28 = vpop.xlane.xlu0 %165  ;;  %v272_v29 = vadd.f32 %v553_v26, %v249_v48  ;;  %v228_v53 = vmul.f32 %v317_v50, %v472_v54  ;;  %326 = vrsqrt.f32 %v201_v49  ;;  %v187_v56 = vmul.f32 0.03125, %v163_v52 }
 0x13f   :  { %287 = vst.msk [vmem:[%s669_s3 + $0x8] sm:$0xff] %vm30_vm0, %v271_v51  ;;  %v250_v57 = vmul.f32 %v547_v14, %v227_v37  ;;  %328 = vrsqrt.f32 %v202_v44  ;;  %v188_v58 = vmul.f32 0.03125, %v166_v28 }
 0x140   :  { %v319_v59 = vpop.eup %318  ;;  %288 = vst.msk [vmem:[%s669_s3 + $0x10] sm:$0xff] %vm30_vm0, %v272_v29  ;;  %v251_v45 = vmul.f32 %v547_v14, %v228_v53  ;;  %v203_v54 = vadd.f32 1e-05, %v187_v56 }
 0x141   :  { %v321_v60 = vpop.eup %320  ;;  %v273_v61 = vadd.f32 %v553_v26, %v250_v57  ;;  %v229_v62 = vmul.f32 %v319_v59, %v474_v55  ;;  %v204_v63 = vadd.f32 1e-05, %v188_v58  ;;  %v169_v2 = vpop.xlane.xlu1 %168 }
 0x142   :  { %v172_v3 = vpop.xlane.xlu0 %171  ;;  %v274_v4 = vadd.f32 %v553_v26, %v251_v45  ;;  %v230_v5 = vmul.f32 %v321_v60, %v483_v0  ;;  %330 = vrsqrt.f32 %v203_v54  ;;  %v189_v6 = vmul.f32 0.03125, %v169_v2 }
 0x143   :  { %289 = vst.msk [vmem:[%s669_s3 + $0x18] sm:$0xff] %vm30_vm0, %v273_v61  ;;  %v252_v7 = vmul.f32 %v547_v14, %v229_v62  ;;  %332 = vrsqrt.f32 %v204_v63  ;;  %v190_v8 = vmul.f32 0.03125, %v172_v3 }
 0x144   :  { %v323_v9 = vpop.eup %322  ;;  %290 = vst.msk [vmem:[%s669_s3 + $0x20] sm:$0xff] %vm30_vm0, %v274_v4  ;;  %v253_v55 = vmul.f32 %v547_v14, %v230_v5  ;;  %v205_v0 = vadd.f32 1e-05, %v189_v6 }
 0x145   :  { %v325_v12 = vpop.eup %324  ;;  %v275_v13 = vadd.f32 %v553_v26, %v252_v7  ;;  %v231_v15 = vmul.f32 %v323_v9, %v486_v1  ;;  %v206_v18 = vadd.f32 1e-05, %v190_v8  ;;  %v175_v19 = vpop.xlane.xlu1 %174 }
 0x146   :  { %v276_v22 = vadd.f32 %v553_v26, %v253_v55  ;;  %v232_v16 = vmul.f32 %v325_v12, %v495_v10  ;;  %334 = vrsqrt.f32 %v205_v0  ;;  %v191_v27 = vmul.f32 0.03125, %v175_v19 }
 0x147   :  { %291 = vst.msk [vmem:[%s669_s3 + $0x28] sm:$0xff] %vm30_vm0, %v275_v13  ;;  %v254_v30 = vmul.f32 %v547_v14, %v231_v15  ;;  %336 = vrsqrt.f32 %v206_v18 }
 0x148   :  { %v327_v31 = vpop.eup %326  ;;  %292 = vst.msk [vmem:[%s669_s3 + $0x30] sm:$0xff] %vm30_vm0, %v276_v22  ;;  %v255_v1 = vmul.f32 %v547_v14, %v232_v16  ;;  %v207_v32 = vadd.f32 1e-05, %v191_v27 }
 0x149   :  { %v329_v10 = vpop.eup %328  ;;  %v277_v33 = vadd.f32 %v553_v26, %v254_v30  ;;  %v233_v34 = vmul.f32 %v327_v31, %v498_v11 }
 0x14a   :  { %v278_v20 = vadd.f32 %v553_v26, %v255_v1  ;;  %v234_v38 = vmul.f32 %v329_v10, %v507_v23  ;;  %338 = vrsqrt.f32 %v207_v32 }
 0x14b   :  { %293 = vst.msk [vmem:[%s669_s3 + $0x38] sm:$0xff] %vm30_vm0, %v277_v33  ;;  %v256_v36 = vmul.f32 %v547_v14, %v233_v34 }
 0x14c   :  { %v331_v39 = vpop.eup %330  ;;  %294 = vst.msk [vmem:[%s669_s3 + $0x40] sm:$0xff] %vm30_vm0, %v278_v20  ;;  %v257_v11 = vmul.f32 %v547_v14, %v234_v38 }
 0x14d   :  { %v333_v40 = vpop.eup %332  ;;  %v279_v41 = vadd.f32 %v553_v26, %v256_v36  ;;  %v235_v23 = vmul.f32 %v331_v39, %v510_v17 }
 0x14e   :  { %v280_v42 = vadd.f32 %v553_v26, %v257_v11  ;;  %v236_v43 = vmul.f32 %v333_v40, %v519_v35 }
 0x14f   :  { %295 = vst.msk [vmem:[%s669_s3 + $0x48] sm:$0xff] %vm30_vm0, %v279_v41  ;;  %v258_v46 = vmul.f32 %v547_v14, %v235_v23 }
 0x150   :  { %v335_v24 = vpop.eup %334  ;;  %296 = vst.msk [vmem:[%s669_s3 + $0x50] sm:$0xff] %vm30_vm0, %v280_v42  ;;  %v259_v48 = vmul.f32 %v547_v14, %v236_v43 }
 0x151   :  { %v337_v17 = vpop.eup %336  ;;  %v281_v49 = vadd.f32 %v553_v26, %v258_v46  ;;  %v237_v35 = vmul.f32 %v335_v24, %v522_v21 }
 0x152   :  { %v282_v44 = vadd.f32 %v553_v26, %v259_v48  ;;  %v238_v50 = vmul.f32 %v337_v17, %v531_v47 }
 0x153   :  { %297 = vst.msk [vmem:[%s669_s3 + $0x58] sm:$0xff] %vm30_vm0, %v281_v49  ;;  %v260_v51 = vmul.f32 %v547_v14, %v237_v35 }
 0x154   :  { %v339_v37 = vpop.eup %338  ;;  %298 = vst.msk [vmem:[%s669_s3 + $0x60] sm:$0xff] %vm30_vm0, %v282_v44  ;;  %v261_v52 = vmul.f32 %v547_v14, %v238_v50 }
 0x155   :  { %v283_v21 = vadd.f32 %v553_v26, %v260_v51  ;;  %v239_v28 = vmul.f32 %v339_v37, %v534_v25 }
 0x156   :  { %v284_v47 = vadd.f32 %v553_v26, %v261_v52 }
 0x157   :  { %299 = vst.msk [vmem:[%s669_s3 + $0x68] sm:$0xff] %vm30_vm0, %v283_v21  ;;  %v262_v29 = vmul.f32 %v547_v14, %v239_v28 }
 0x158   :  { %300 = vst.msk [vmem:[%s669_s3 + $0x70] sm:$0xff] %vm30_vm0, %v284_v47 }
 0x159   :  { %v285_v53 = vadd.f32 %v553_v26, %v262_v29 }
 0x15b   :  { %301 = vst.msk [vmem:[%s669_s3 + $0x78] sm:$0xff] %vm30_vm0, %v285_v53 }

</bundles_post_ra>
